<compile_context>
chip_gen: v7x
topology: tpu7x:2x2x1
jax: 0.10.0
libtpu: 0.0.40
codegen_flags: <defaults>
</compile_context>

<pallas_src>
import functools
import math

import jax
import jax.numpy as jnp
from jax import lax
from jax.experimental import pallas as pl
from jax.experimental.pallas import tpu as pltpu


def _mha_score_kernel(head_ref, tail_ref, wh_ref, wt_ref, out_ref,
                      hp_ref, tp_ref, *, num_heads, cache_tail, compute_dtype):
    # head_ref: (1, TQ, D_in)   tail_ref: (1, TK, D_in)   (already compute_dtype)
    # wh_ref / wt_ref: (H, D_in, depth)   (Wh pre-scaled by 1/sqrt(depth))
    # out_ref: (1, H, TQ, TK)
    # hp_ref:  VMEM (H, TQ, depth)                       head proj, cached over k
    # tp_ref:  VMEM (cache_tiles*H, TK, depth)           tail proj, cached over q
    q = pl.program_id(1)
    k = pl.program_id(2)

    # ---- head projection: once per (b, q-tile), reused for every k tile.
    # Correct only while the k grid axis stays "arbitrary" (in-order, innermost).
    @pl.when(k == 0)
    def _():
        h = head_ref[0]                                   # (TQ, D_in)
        for i in range(num_heads):
            hp_ref[i] = jnp.dot(
                h, wh_ref[i], preferred_element_type=jnp.float32
            ).astype(compute_dtype)

    # ---- tail projection: cached across the q axis when cache_tail is set.
    # Correct only while the q grid axis stays "arbitrary" (q == 0 runs first
    # for every batch on a given core).
    slot = k if cache_tail else 0

    def _project_tail():
        t = tail_ref[0]                                   # (TK, D_in)
        for i in range(num_heads):
            tp_ref[slot * num_heads + i] = jnp.dot(
                t, wt_ref[i], preferred_element_type=jnp.float32
            ).astype(compute_dtype)

    if cache_tail:
        # TODO(synk): also move the tail input to memory_space=pl.ANY with a
        # manual DMA under this q == 0 guard so the (1, TK, D_in) tail tile is
        # not re-fetched for q > 0.
        @pl.when(q == 0)
        def _():
            _project_tail()
    else:
        _project_tail()

    # ---- per-head score: NT dot_general (contract last dims) -> no transposes.
    # TODO(synk): for very large num_heads, move heads onto a grid axis (or
    # chunk them) instead of unrolling here.
    for i in range(num_heads):
        score = lax.dot_general(
            hp_ref[i], tp_ref[slot * num_heads + i],
            (((1,), (1,)), ((), ())),
            preferred_element_type=jnp.float32)           # (TQ, TK)
        out_ref[0, i] = score.astype(out_ref.dtype)


def _round_up(x, m):
    return -(-x // m) * m


def _padded_elems(shape):
    """Approx. VMEM footprint in elements (lane dim -> 128, sublane dim -> 8)."""
    if len(shape) == 0:
        return 1
    if len(shape) == 1:
        return _round_up(shape[0], 128)
    lead = math.prod(shape[:-2]) if len(shape) > 2 else 1
    return lead * _round_up(shape[-2], 8) * _round_up(shape[-1], 128)


def _pick_tile_sublane(dim, preferred):
    """Tile for a sublane dim: multiple of 8 that divides `dim`, or the full dim."""
    if dim <= preferred:
        return dim
    t = (preferred // 8) * 8
    while t >= 8:
        if dim % t == 0:
            return t
        t -= 8
    return dim


def _pick_tile_lane(dim, preferred):
    """Tile for a lane dim: multiple of 128 that divides `dim`, or the full dim."""
    if dim <= preferred:
        return dim
    t = (preferred // 128) * 128
    while t >= 128:
        if dim % t == 0:
            return t
        t -= 128
    return dim


def multi_head_attention_scores(tail, head, wh_t, wt_t, *, num_heads,
                                compute_dtype=jnp.bfloat16,
                                out_dtype=jnp.bfloat16,
                                tile_q=256, tile_k=256,
                                tail_cache_budget_bytes=8 * 1024 * 1024):
    """Attention scores matching the PyTorch module's forward().

    tail, head: (B, S, D_in); wh_t / wt_t: (D_in, D_out) = torch Linear weight
    transposed.  Returns (B, num_heads, S_head, S_tail).

    Defaults are the fast path (bf16 compute, bf16 output -- the score
    writeback dominates HBM traffic).  Use compute_dtype=out_dtype=jnp.float32
    for a bit-faithful f32 path.  tile_q/tile_k=512 is recommended on
    v5e/v6e (128 MiB VMEM); keep 256 on v7x (64 MiB physical VMEM).
    """
    B, S_h, D_in = head.shape
    _, S_t, _ = tail.shape
    D_out = wh_t.shape[1]
    assert D_out % num_heads == 0
    depth = D_out // num_heads

    # Per-head weight layout (H, D_in, depth); fold 1/sqrt(depth) into Wh once
    # (removes a per-q-tile VPU multiply in-kernel); pre-cast to compute_dtype.
    scale = 1.0 / math.sqrt(depth)
    wh_heads = (wh_t.astype(jnp.float32) * scale).reshape(D_in, num_heads, depth)
    wh_heads = jnp.transpose(wh_heads, (1, 0, 2)).astype(compute_dtype)
    wt_heads = jnp.transpose(wt_t.reshape(D_in, num_heads, depth),
                             (1, 0, 2)).astype(compute_dtype)

    # Pre-cast activations: kernel streams compute_dtype directly (no in-kernel
    # casts; halves input DMA bytes in the bf16 path).
    head_c = head.astype(compute_dtype)
    tail_c = tail.astype(compute_dtype)

    TQ = _pick_tile_sublane(S_h, tile_q)   # sublane dim of head/out blocks
    TK = _pick_tile_lane(S_t, tile_k)      # lane dim of the output block
    assert S_h % TQ == 0 and S_t % TK == 0
    q_tiles, k_tiles = S_h // TQ, S_t // TK
    grid = (B, q_tiles, k_tiles)

    in_b = jnp.dtype(compute_dtype).itemsize
    out_b = jnp.dtype(out_dtype).itemsize

    # Cache the tail projection across the q axis when the slab fits the budget
    # (removes (q_tiles-1)/q_tiles of the tail-projection MXU work).
    tail_cache_bytes = k_tiles * num_heads * _padded_elems((TK, depth)) * in_b
    cache_tail = (q_tiles > 1) and (tail_cache_bytes <= tail_cache_budget_bytes)
    cache_tiles = k_tiles if cache_tail else 1

    # Rough VMEM budget; only raise the scoped limit when actually needed.
    vmem_est = (
        2 * (_padded_elems((TQ, D_in)) + _padded_elems((TK, D_in))) * in_b   # activations, dbl-buffered
        + 2 * num_heads * _padded_elems((D_in, depth)) * in_b                # both weights, single buffer
        + 2 * num_heads * _padded_elems((TQ, TK)) * out_b                    # output block, dbl-buffered
        + num_heads * _padded_elems((TQ, depth)) * in_b                      # hp scratch
        + cache_tiles * num_heads * _padded_elems((TK, depth)) * in_b)       # tp scratch / cache
    vmem_limit = None
    if vmem_est > 24 * 1024 * 1024:
        # TODO(synk): on v7x (64 MiB physical VMEM) prefer shrinking TQ/TK or
        # the tail-cache budget rather than raising this past ~56 MiB.
        vmem_limit = min(int(vmem_est * 1.25) + (4 << 20), 100 << 20)

    # k must stay "arbitrary" (hp cache relies on in-order k); q must stay
    # "arbitrary" whenever the tail-projection cache is enabled.
    dim_sem = ("parallel",
               "arbitrary" if cache_tail else "parallel",
               "arbitrary")

    kernel = functools.partial(
        _mha_score_kernel, num_heads=num_heads, cache_tail=cache_tail,
        compute_dtype=compute_dtype)

    def _weight_spec():
        # Constant index_map -> single buffer (double-buffering wastes VMEM).
        return pl.BlockSpec((num_heads, D_in, depth), lambda b, q, k: (0, 0, 0),
                            pipeline_mode=pl.Buffered(1))

    return pl.pallas_call(
        kernel,
        out_shape=jax.ShapeDtypeStruct((B, num_heads, S_h, S_t), out_dtype),
        grid_spec=pltpu.PrefetchScalarGridSpec(
            num_scalar_prefetch=0,
            grid=grid,
            in_specs=[
                pl.BlockSpec((1, TQ, D_in), lambda b, q, k: (b, q, 0)),   # head tile
                pl.BlockSpec((1, TK, D_in), lambda b, q, k: (b, k, 0)),   # tail tile
                _weight_spec(),                                           # Wh (pre-scaled)
                _weight_spec(),                                           # Wt
            ],
            out_specs=pl.BlockSpec((1, num_heads, TQ, TK),
                                   lambda b, q, k: (b, 0, q, k)),
            scratch_shapes=[
                pltpu.VMEM((num_heads, TQ, depth), compute_dtype),                 # hp cache
                pltpu.VMEM((cache_tiles * num_heads, TK, depth), compute_dtype),   # tp cache/staging
            ],
        ),
        compiler_params=pltpu.CompilerParams(
            dimension_semantics=dim_sem,
            vmem_limit_bytes=vmem_limit,
        ),
    )(head_c, tail_c, wh_heads, wt_heads)


def _reference(tail, head, wh_t, wt_t, num_heads):
    B = head.shape[0]
    depth = wh_t.shape[1] // num_heads
    hp = head @ wh_t
    tp = tail @ wt_t
    hp = hp.reshape(B, -1, num_heads, depth).transpose(0, 2, 1, 3)
    tp = tp.reshape(B, -1, num_heads, depth).transpose(0, 2, 1, 3)
    return jnp.einsum("bhqd,bhkd->bhqk", hp, tp) / jnp.sqrt(jnp.float32(depth))


if __name__ == "__main__":
    key = jax.random.PRNGKey(0)
    k1, k2, k3, k4, k5, k6 = jax.random.split(key, 6)

    # ---- Case 1: shapes implied by the module (batch=2, seq=8, hidden=32). ----
    batch, seq, input_size, output_size, num_heads = 2, 8, 32, 32, 4
    tail = jax.random.normal(k1, (batch, seq, input_size), dtype=jnp.float32)
    head = jax.random.normal(k2, (batch, seq, input_size), dtype=jnp.float32)
    # Linear(bias=False) weights stored as (in, out) = W^T.
    wh_t = jax.random.normal(k3, (input_size, output_size), dtype=jnp.float32) * 0.1
    wt_t = jax.random.normal(k4, (input_size, output_size), dtype=jnp.float32) * 0.1

    ref = _reference(tail, head, wh_t, wt_t, num_heads)

    # f32 compute + f32 output: tight correctness check.
    out_f32 = multi_head_attention_scores(
        tail, head, wh_t, wt_t, num_heads=num_heads,
        compute_dtype=jnp.float32, out_dtype=jnp.float32)
    out_f32 = jax.block_until_ready(out_f32)
    assert out_f32.shape == (batch, num_heads, seq, seq)
    assert jnp.allclose(out_f32, ref, atol=1e-3, rtol=1e-3)

    # Default fast path: bf16 compute + bf16 output writeback.
    out_bf16 = multi_head_attention_scores(
        tail, head, wh_t, wt_t, num_heads=num_heads)
    out_bf16 = jax.block_until_ready(out_bf16)
    assert out_bf16.shape == (batch, num_heads, seq, seq)
    assert jnp.allclose(out_bf16.astype(jnp.float32), ref, atol=5e-2, rtol=5e-2)

    # ---- Case 2: multi-tile grid exercising the hp (k==0) and tail-projection
    # (q==0) caches, dynamic cache-slot indexing and single-buffered weights. ----
    b2, sh2, st2, d_in2, h2 = 2, 32, 256, 32, 4
    tail2 = jax.random.normal(k5, (b2, st2, d_in2), dtype=jnp.float32)
    head2 = jax.random.normal(k6, (b2, sh2, d_in2), dtype=jnp.float32)
    ref2 = _reference(tail2, head2, wh_t, wt_t, h2)

    out2 = multi_head_attention_scores(
        tail2, head2, wh_t, wt_t, num_heads=h2,
        compute_dtype=jnp.float32, out_dtype=jnp.float32,
        tile_q=16, tile_k=128)
    out2 = jax.block_until_ready(out2)
    assert out2.shape == (b2, h2, sh2, st2)
    assert jnp.allclose(out2, ref2, atol=1e-3, rtol=1e-3)

    print("KERNEL_OK")
</pallas_src>

<mosaic_0001>
module attributes {stable_mosaic.version = 11 : i64} {
  func.func @_mha_score_kernel(%arg0: i32, %arg1: i32, %arg2: i32, %arg3: memref<1x8x32xf32, #tpu.memory_space<vmem>>, %arg4: memref<1x8x32xf32, #tpu.memory_space<vmem>>, %arg5: memref<4x32x8xf32, #tpu.memory_space<vmem>>, %arg6: memref<4x32x8xf32, #tpu.memory_space<vmem>>, %arg7: memref<1x4x8x8xf32, #tpu.memory_space<vmem>>, %arg8: memref<4x8x8xf32, #tpu.memory_space<vmem>>, %arg9: memref<4x8x8xf32, #tpu.memory_space<vmem>>) attributes {dimension_semantics = [#tpu.dimension_semantics<parallel>, #tpu.dimension_semantics<parallel>, #tpu.dimension_semantics<arbitrary>], iteration_bounds = array<i64: 2, 1, 1>, scalar_prefetch = 0 : i64, scratch_operands = 2 : i64, tpu.core_type = #tpu.core_type<tc>, window_params = [{transform_indices = @transform_0, window_bounds = array<i64: 1, 8, 32>}, {transform_indices = @transform_1, window_bounds = array<i64: 1, 8, 32>}, {pipeline_mode = #tpu.pipeline_mode<synchronous>, transform_indices = @transform_2, window_bounds = array<i64: 4, 32, 8>}, {pipeline_mode = #tpu.pipeline_mode<synchronous>, transform_indices = @transform_3, window_bounds = array<i64: 4, 32, 8>}, {transform_indices = @transform_4, window_bounds = array<i64: 1, 4, 8, 8>}]} {
    %c0_i32 = arith.constant 0 : i32
    %0 = arith.cmpi eq, %arg2, %c0_i32 : i32
    %1 = arith.extui %0 : i1 to i32
    %c0_i32_0 = arith.constant 0 : i32
    %2 = arith.cmpi ne, %1, %c0_i32_0 : i32
    scf.if %2 {
      %c0_71 = arith.constant 0 : index
      %c0_72 = arith.constant 0 : index
      %c0_73 = arith.constant 0 : index
      %61 = vector.load %arg3[%c0_71, %c0_72, %c0_73] : memref<1x8x32xf32, #tpu.memory_space<vmem>>, vector<1x8x32xf32>
      %62 = vector.shape_cast %61 : vector<1x8x32xf32> to vector<8x32xf32>
      %c0_74 = arith.constant 0 : index
      %c0_75 = arith.constant 0 : index
      %c0_76 = arith.constant 0 : index
      %63 = vector.load %arg5[%c0_74, %c0_75, %c0_76] : memref<4x32x8xf32, #tpu.memory_space<vmem>>, vector<1x32x8xf32>
      %64 = vector.shape_cast %63 : vector<1x32x8xf32> to vector<32x8xf32>
      %cst_77 = arith.constant dense<0.000000e+00> : vector<8x8xf32>
      %65 = tpu.matmul %62, %64, %cst_77 {dimension_numbers = #tpu.dot_dimension_numbers<[1], [0], [0], [1], [0, 0, 1, 1], [], []>} : vector<8x32xf32>, vector<32x8xf32>, vector<8x8xf32> -> vector<8x8xf32>
      %c0_78 = arith.constant 0 : index
      %c0_79 = arith.constant 0 : index
      %c0_80 = arith.constant 0 : index
      %66 = vector.load %arg8[%c0_78, %c0_79, %c0_80] : memref<4x8x8xf32, #tpu.memory_space<vmem>>, vector<1x8x8xf32>
      %67 = vector.shape_cast %66 : vector<1x8x8xf32> to vector<8x8xf32>
      %68 = vector.shape_cast %65 : vector<8x8xf32> to vector<1x8x8xf32>
      tpu.vector_store %arg8[%c0_78, %c0_79, %c0_80], %68 {strides = array<i32>} : memref<4x8x8xf32, #tpu.memory_space<vmem>>, vector<1x8x8xf32>,
      %c1_81 = arith.constant 1 : index
      %c0_82 = arith.constant 0 : index
      %c0_83 = arith.constant 0 : index
      %69 = vector.load %arg5[%c1_81, %c0_82, %c0_83] : memref<4x32x8xf32, #tpu.memory_space<vmem>>, vector<1x32x8xf32>
      %70 = vector.shape_cast %69 : vector<1x32x8xf32> to vector<32x8xf32>
      %cst_84 = arith.constant dense<0.000000e+00> : vector<8x8xf32>
      %71 = tpu.matmul %62, %70, %cst_84 {dimension_numbers = #tpu.dot_dimension_numbers<[1], [0], [0], [1], [0, 0, 1, 1], [], []>} : vector<8x32xf32>, vector<32x8xf32>, vector<8x8xf32> -> vector<8x8xf32>
      %c1_85 = arith.constant 1 : index
      %c0_86 = arith.constant 0 : index
      %c0_87 = arith.constant 0 : index
      %72 = vector.load %arg8[%c1_85, %c0_86, %c0_87] : memref<4x8x8xf32, #tpu.memory_space<vmem>>, vector<1x8x8xf32>
      %73 = vector.shape_cast %72 : vector<1x8x8xf32> to vector<8x8xf32>
      %74 = vector.shape_cast %71 : vector<8x8xf32> to vector<1x8x8xf32>
      tpu.vector_store %arg8[%c1_85, %c0_86, %c0_87], %74 {strides = array<i32>} : memref<4x8x8xf32, #tpu.memory_space<vmem>>, vector<1x8x8xf32>,
      %c2_88 = arith.constant 2 : index
      %c0_89 = arith.constant 0 : index
      %c0_90 = arith.constant 0 : index
      %75 = vector.load %arg5[%c2_88, %c0_89, %c0_90] : memref<4x32x8xf32, #tpu.memory_space<vmem>>, vector<1x32x8xf32>
      %76 = vector.shape_cast %75 : vector<1x32x8xf32> to vector<32x8xf32>
      %cst_91 = arith.constant dense<0.000000e+00> : vector<8x8xf32>
      %77 = tpu.matmul %62, %76, %cst_91 {dimension_numbers = #tpu.dot_dimension_numbers<[1], [0], [0], [1], [0, 0, 1, 1], [], []>} : vector<8x32xf32>, vector<32x8xf32>, vector<8x8xf32> -> vector<8x8xf32>
      %c2_92 = arith.constant 2 : index
      %c0_93 = arith.constant 0 : index
      %c0_94 = arith.constant 0 : index
      %78 = vector.load %arg8[%c2_92, %c0_93, %c0_94] : memref<4x8x8xf32, #tpu.memory_space<vmem>>, vector<1x8x8xf32>
      %79 = vector.shape_cast %78 : vector<1x8x8xf32> to vector<8x8xf32>
      %80 = vector.shape_cast %77 : vector<8x8xf32> to vector<1x8x8xf32>
      tpu.vector_store %arg8[%c2_92, %c0_93, %c0_94], %80 {strides = array<i32>} : memref<4x8x8xf32, #tpu.memory_space<vmem>>, vector<1x8x8xf32>,
      %c3_95 = arith.constant 3 : index
      %c0_96 = arith.constant 0 : index
      %c0_97 = arith.constant 0 : index
      %81 = vector.load %arg5[%c3_95, %c0_96, %c0_97] : memref<4x32x8xf32, #tpu.memory_space<vmem>>, vector<1x32x8xf32>
      %82 = vector.shape_cast %81 : vector<1x32x8xf32> to vector<32x8xf32>
      %cst_98 = arith.constant dense<0.000000e+00> : vector<8x8xf32>
      %83 = tpu.matmul %62, %82, %cst_98 {dimension_numbers = #tpu.dot_dimension_numbers<[1], [0], [0], [1], [0, 0, 1, 1], [], []>} : vector<8x32xf32>, vector<32x8xf32>, vector<8x8xf32> -> vector<8x8xf32>
      %c3_99 = arith.constant 3 : index
      %c0_100 = arith.constant 0 : index
      %c0_101 = arith.constant 0 : index
      %84 = vector.load %arg8[%c3_99, %c0_100, %c0_101] : memref<4x8x8xf32, #tpu.memory_space<vmem>>, vector<1x8x8xf32>
      %85 = vector.shape_cast %84 : vector<1x8x8xf32> to vector<8x8xf32>
      %86 = vector.shape_cast %83 : vector<8x8xf32> to vector<1x8x8xf32>
      tpu.vector_store %arg8[%c3_99, %c0_100, %c0_101], %86 {strides = array<i32>} : memref<4x8x8xf32, #tpu.memory_space<vmem>>, vector<1x8x8xf32>,
    } else {
    }
    %c0 = arith.constant 0 : index
    %c0_1 = arith.constant 0 : index
    %c0_2 = arith.constant 0 : index
    %3 = vector.load %arg4[%c0, %c0_1, %c0_2] : memref<1x8x32xf32, #tpu.memory_space<vmem>>, vector<1x8x32xf32>
    %4 = vector.shape_cast %3 : vector<1x8x32xf32> to vector<8x32xf32>
    %c0_3 = arith.constant 0 : index
    %c0_4 = arith.constant 0 : index
    %c0_5 = arith.constant 0 : index
    %5 = vector.load %arg6[%c0_3, %c0_4, %c0_5] : memref<4x32x8xf32, #tpu.memory_space<vmem>>, vector<1x32x8xf32>
    %6 = vector.shape_cast %5 : vector<1x32x8xf32> to vector<32x8xf32>
    %cst = arith.constant dense<0.000000e+00> : vector<8x8xf32>
    %7 = tpu.matmul %4, %6, %cst {dimension_numbers = #tpu.dot_dimension_numbers<[1], [0], [0], [1], [0, 0, 1, 1], [], []>} : vector<8x32xf32>, vector<32x8xf32>, vector<8x8xf32> -> vector<8x8xf32>
    %c0_6 = arith.constant 0 : index
    %c0_7 = arith.constant 0 : index
    %c0_8 = arith.constant 0 : index
    %8 = vector.load %arg9[%c0_6, %c0_7, %c0_8] : memref<4x8x8xf32, #tpu.memory_space<vmem>>, vector<1x8x8xf32>
    %9 = vector.shape_cast %8 : vector<1x8x8xf32> to vector<8x8xf32>
    %10 = vector.shape_cast %7 : vector<8x8xf32> to vector<1x8x8xf32>
    tpu.vector_store %arg9[%c0_6, %c0_7, %c0_8], %10 {strides = array<i32>} : memref<4x8x8xf32, #tpu.memory_space<vmem>>, vector<1x8x8xf32>,
    %c1 = arith.constant 1 : index
    %c0_9 = arith.constant 0 : index
    %c0_10 = arith.constant 0 : index
    %11 = vector.load %arg6[%c1, %c0_9, %c0_10] : memref<4x32x8xf32, #tpu.memory_space<vmem>>, vector<1x32x8xf32>
    %12 = vector.shape_cast %11 : vector<1x32x8xf32> to vector<32x8xf32>
    %cst_11 = arith.constant dense<0.000000e+00> : vector<8x8xf32>
    %13 = tpu.matmul %4, %12, %cst_11 {dimension_numbers = #tpu.dot_dimension_numbers<[1], [0], [0], [1], [0, 0, 1, 1], [], []>} : vector<8x32xf32>, vector<32x8xf32>, vector<8x8xf32> -> vector<8x8xf32>
    %c1_12 = arith.constant 1 : index
    %c0_13 = arith.constant 0 : index
    %c0_14 = arith.constant 0 : index
    %14 = vector.load %arg9[%c1_12, %c0_13, %c0_14] : memref<4x8x8xf32, #tpu.memory_space<vmem>>, vector<1x8x8xf32>
    %15 = vector.shape_cast %14 : vector<1x8x8xf32> to vector<8x8xf32>
    %16 = vector.shape_cast %13 : vector<8x8xf32> to vector<1x8x8xf32>
    tpu.vector_store %arg9[%c1_12, %c0_13, %c0_14], %16 {strides = array<i32>} : memref<4x8x8xf32, #tpu.memory_space<vmem>>, vector<1x8x8xf32>,
    %c2 = arith.constant 2 : index
    %c0_15 = arith.constant 0 : index
    %c0_16 = arith.constant 0 : index
    %17 = vector.load %arg6[%c2, %c0_15, %c0_16] : memref<4x32x8xf32, #tpu.memory_space<vmem>>, vector<1x32x8xf32>
    %18 = vector.shape_cast %17 : vector<1x32x8xf32> to vector<32x8xf32>
    %cst_17 = arith.constant dense<0.000000e+00> : vector<8x8xf32>
    %19 = tpu.matmul %4, %18, %cst_17 {dimension_numbers = #tpu.dot_dimension_numbers<[1], [0], [0], [1], [0, 0, 1, 1], [], []>} : vector<8x32xf32>, vector<32x8xf32>, vector<8x8xf32> -> vector<8x8xf32>
    %c2_18 = arith.constant 2 : index
    %c0_19 = arith.constant 0 : index
    %c0_20 = arith.constant 0 : index
    %20 = vector.load %arg9[%c2_18, %c0_19, %c0_20] : memref<4x8x8xf32, #tpu.memory_space<vmem>>, vector<1x8x8xf32>
    %21 = vector.shape_cast %20 : vector<1x8x8xf32> to vector<8x8xf32>
    %22 = vector.shape_cast %19 : vector<8x8xf32> to vector<1x8x8xf32>
    tpu.vector_store %arg9[%c2_18, %c0_19, %c0_20], %22 {strides = array<i32>} : memref<4x8x8xf32, #tpu.memory_space<vmem>>, vector<1x8x8xf32>,
    %c3 = arith.constant 3 : index
    %c0_21 = arith.constant 0 : index
    %c0_22 = arith.constant 0 : index
    %23 = vector.load %arg6[%c3, %c0_21, %c0_22] : memref<4x32x8xf32, #tpu.memory_space<vmem>>, vector<1x32x8xf32>
    %24 = vector.shape_cast %23 : vector<1x32x8xf32> to vector<32x8xf32>
    %cst_23 = arith.constant dense<0.000000e+00> : vector<8x8xf32>
    %25 = tpu.matmul %4, %24, %cst_23 {dimension_numbers = #tpu.dot_dimension_numbers<[1], [0], [0], [1], [0, 0, 1, 1], [], []>} : vector<8x32xf32>, vector<32x8xf32>, vector<8x8xf32> -> vector<8x8xf32>
    %c3_24 = arith.constant 3 : index
    %c0_25 = arith.constant 0 : index
    %c0_26 = arith.constant 0 : index
    %26 = vector.load %arg9[%c3_24, %c0_25, %c0_26] : memref<4x8x8xf32, #tpu.memory_space<vmem>>, vector<1x8x8xf32>
    %27 = vector.shape_cast %26 : vector<1x8x8xf32> to vector<8x8xf32>
    %28 = vector.shape_cast %25 : vector<8x8xf32> to vector<1x8x8xf32>
    tpu.vector_store %arg9[%c3_24, %c0_25, %c0_26], %28 {strides = array<i32>} : memref<4x8x8xf32, #tpu.memory_space<vmem>>, vector<1x8x8xf32>,
    %c0_27 = arith.constant 0 : index
    %c0_28 = arith.constant 0 : index
    %c0_29 = arith.constant 0 : index
    %29 = vector.load %arg8[%c0_27, %c0_28, %c0_29] : memref<4x8x8xf32, #tpu.memory_space<vmem>>, vector<1x8x8xf32>
    %30 = vector.shape_cast %29 : vector<1x8x8xf32> to vector<8x8xf32>
    %c0_30 = arith.constant 0 : index
    %c0_31 = arith.constant 0 : index
    %c0_32 = arith.constant 0 : index
    %31 = vector.load %arg9[%c0_30, %c0_31, %c0_32] : memref<4x8x8xf32, #tpu.memory_space<vmem>>, vector<1x8x8xf32>
    %32 = vector.shape_cast %31 : vector<1x8x8xf32> to vector<8x8xf32>
    %cst_33 = arith.constant dense<0.000000e+00> : vector<8x8xf32>
    %33 = tpu.matmul %30, %32, %cst_33 {dimension_numbers = #tpu.dot_dimension_numbers<[1], [1], [0], [0], [0, 0, 1, 0], [], []>} : vector<8x8xf32>, vector<8x8xf32>, vector<8x8xf32> -> vector<8x8xf32>
    %c0_34 = arith.constant 0 : index
    %c0_35 = arith.constant 0 : index
    %c0_36 = arith.constant 0 : index
    %c0_37 = arith.constant 0 : index
    %34 = vector.load %arg7[%c0_34, %c0_35, %c0_36, %c0_37] : memref<1x4x8x8xf32, #tpu.memory_space<vmem>>, vector<1x1x8x8xf32>
    %35 = vector.shape_cast %34 : vector<1x1x8x8xf32> to vector<8x8xf32>
    %36 = vector.shape_cast %33 : vector<8x8xf32> to vector<1x1x8x8xf32>
    tpu.vector_store %arg7[%c0_34, %c0_35, %c0_36, %c0_37], %36 {strides = array<i32>} : memref<1x4x8x8xf32, #tpu.memory_space<vmem>>, vector<1x1x8x8xf32>,
    %c1_38 = arith.constant 1 : index
    %c0_39 = arith.constant 0 : index
    %c0_40 = arith.constant 0 : index
    %37 = vector.load %arg8[%c1_38, %c0_39, %c0_40] : memref<4x8x8xf32, #tpu.memory_space<vmem>>, vector<1x8x8xf32>
    %38 = vector.shape_cast %37 : vector<1x8x8xf32> to vector<8x8xf32>
    %c1_41 = arith.constant 1 : index
    %c0_42 = arith.constant 0 : index
    %c0_43 = arith.constant 0 : index
    %39 = vector.load %arg9[%c1_41, %c0_42, %c0_43] : memref<4x8x8xf32, #tpu.memory_space<vmem>>, vector<1x8x8xf32>
    %40 = vector.shape_cast %39 : vector<1x8x8xf32> to vector<8x8xf32>
    %cst_44 = arith.constant dense<0.000000e+00> : vector<8x8xf32>
    %41 = tpu.matmul %38, %40, %cst_44 {dimension_numbers = #tpu.dot_dimension_numbers<[1], [1], [0], [0], [0, 0, 1, 0], [], []>} : vector<8x8xf32>, vector<8x8xf32>, vector<8x8xf32> -> vector<8x8xf32>
    %c0_45 = arith.constant 0 : index
    %c1_46 = arith.constant 1 : index
    %c0_47 = arith.constant 0 : index
    %c0_48 = arith.constant 0 : index
    %42 = vector.load %arg7[%c0_45, %c1_46, %c0_47, %c0_48] : memref<1x4x8x8xf32, #tpu.memory_space<vmem>>, vector<1x1x8x8xf32>
    %43 = vector.shape_cast %42 : vector<1x1x8x8xf32> to vector<8x8xf32>
    %44 = vector.shape_cast %41 : vector<8x8xf32> to vector<1x1x8x8xf32>
    tpu.vector_store %arg7[%c0_45, %c1_46, %c0_47, %c0_48], %44 {strides = array<i32>} : memref<1x4x8x8xf32, #tpu.memory_space<vmem>>, vector<1x1x8x8xf32>,
    %c2_49 = arith.constant 2 : index
    %c0_50 = arith.constant 0 : index
    %c0_51 = arith.constant 0 : index
    %45 = vector.load %arg8[%c2_49, %c0_50, %c0_51] : memref<4x8x8xf32, #tpu.memory_space<vmem>>, vector<1x8x8xf32>
    %46 = vector.shape_cast %45 : vector<1x8x8xf32> to vector<8x8xf32>
    %c2_52 = arith.constant 2 : index
    %c0_53 = arith.constant 0 : index
    %c0_54 = arith.constant 0 : index
    %47 = vector.load %arg9[%c2_52, %c0_53, %c0_54] : memref<4x8x8xf32, #tpu.memory_space<vmem>>, vector<1x8x8xf32>
    %48 = vector.shape_cast %47 : vector<1x8x8xf32> to vector<8x8xf32>
    %cst_55 = arith.constant dense<0.000000e+00> : vector<8x8xf32>
    %49 = tpu.matmul %46, %48, %cst_55 {dimension_numbers = #tpu.dot_dimension_numbers<[1], [1], [0], [0], [0, 0, 1, 0], [], []>} : vector<8x8xf32>, vector<8x8xf32>, vector<8x8xf32> -> vector<8x8xf32>
    %c0_56 = arith.constant 0 : index
    %c2_57 = arith.constant 2 : index
    %c0_58 = arith.constant 0 : index
    %c0_59 = arith.constant 0 : index
    %50 = vector.load %arg7[%c0_56, %c2_57, %c0_58, %c0_59] : memref<1x4x8x8xf32, #tpu.memory_space<vmem>>, vector<1x1x8x8xf32>
    %51 = vector.shape_cast %50 : vector<1x1x8x8xf32> to vector<8x8xf32>
    %52 = vector.shape_cast %49 : vector<8x8xf32> to vector<1x1x8x8xf32>
    tpu.vector_store %arg7[%c0_56, %c2_57, %c0_58, %c0_59], %52 {strides = array<i32>} : memref<1x4x8x8xf32, #tpu.memory_space<vmem>>, vector<1x1x8x8xf32>,
    %c3_60 = arith.constant 3 : index
    %c0_61 = arith.constant 0 : index
    %c0_62 = arith.constant 0 : index
    %53 = vector.load %arg8[%c3_60, %c0_61, %c0_62] : memref<4x8x8xf32, #tpu.memory_space<vmem>>, vector<1x8x8xf32>
    %54 = vector.shape_cast %53 : vector<1x8x8xf32> to vector<8x8xf32>
    %c3_63 = arith.constant 3 : index
    %c0_64 = arith.constant 0 : index
    %c0_65 = arith.constant 0 : index
    %55 = vector.load %arg9[%c3_63, %c0_64, %c0_65] : memref<4x8x8xf32, #tpu.memory_space<vmem>>, vector<1x8x8xf32>
    %56 = vector.shape_cast %55 : vector<1x8x8xf32> to vector<8x8xf32>
    %cst_66 = arith.constant dense<0.000000e+00> : vector<8x8xf32>
    %57 = tpu.matmul %54, %56, %cst_66 {dimension_numbers = #tpu.dot_dimension_numbers<[1], [1], [0], [0], [0, 0, 1, 0], [], []>} : vector<8x8xf32>, vector<8x8xf32>, vector<8x8xf32> -> vector<8x8xf32>
    %c0_67 = arith.constant 0 : index
    %c3_68 = arith.constant 3 : index
    %c0_69 = arith.constant 0 : index
    %c0_70 = arith.constant 0 : index
    %58 = vector.load %arg7[%c0_67, %c3_68, %c0_69, %c0_70] : memref<1x4x8x8xf32, #tpu.memory_space<vmem>>, vector<1x1x8x8xf32>
    %59 = vector.shape_cast %58 : vector<1x1x8x8xf32> to vector<8x8xf32>
    %60 = vector.shape_cast %57 : vector<8x8xf32> to vector<1x1x8x8xf32>
    tpu.vector_store %arg7[%c0_67, %c3_68, %c0_69, %c0_70], %60 {strides = array<i32>} : memref<1x4x8x8xf32, #tpu.memory_space<vmem>>, vector<1x1x8x8xf32>,
    return
  }
  func.func @transform_0(%arg0: i32, %arg1: i32, %arg2: i32) -> (i32, i32, i32) {
    %c0_i32 = arith.constant 0 : i32
    %c0_i32_0 = arith.constant 0 : i32
    return %arg0, %arg1, %c0_i32 : i32, i32, i32
  }
  func.func @transform_1(%arg0: i32, %arg1: i32, %arg2: i32) -> (i32, i32, i32) {
    %c0_i32 = arith.constant 0 : i32
    %c0_i32_0 = arith.constant 0 : i32
    return %arg0, %arg2, %c0_i32 : i32, i32, i32
  }
  func.func @transform_2(%arg0: i32, %arg1: i32, %arg2: i32) -> (i32, i32, i32) {
    %c0_i32 = arith.constant 0 : i32
    %c0_i32_0 = arith.constant 0 : i32
    %c0_i32_1 = arith.constant 0 : i32
    %c0_i32_2 = arith.constant 0 : i32
    return %c0_i32, %c0_i32_0, %c0_i32_1 : i32, i32, i32
  }
  func.func @transform_3(%arg0: i32, %arg1: i32, %arg2: i32) -> (i32, i32, i32) {
    %c0_i32 = arith.constant 0 : i32
    %c0_i32_0 = arith.constant 0 : i32
    %c0_i32_1 = arith.constant 0 : i32
    %c0_i32_2 = arith.constant 0 : i32
    return %c0_i32, %c0_i32_0, %c0_i32_1 : i32, i32, i32
  }
  func.func @transform_4(%arg0: i32, %arg1: i32, %arg2: i32) -> (i32, i32, i32, i32) {
    %c0_i32 = arith.constant 0 : i32
    %c0_i32_0 = arith.constant 0 : i32
    return %arg0, %c0_i32, %arg1, %arg2 : i32, i32, i32, i32
  }
}

</mosaic_0001>

<bundles_post_ra>
// kernel: tpu_custom_call.1
= control target key start
LH: loop header
LB: loop body
LE: loop exit
PB: predicated region body
PF: predicated region fallthrough
CT: control target
= control target key end

     0   :  { %9 = vsyncpa [#allocation5], 0  ;;  %s2040_s0 = inlined_call_operand.vmem [shape: f32[2,8,32], index: 0, kind: input, shape index: {}]   ;;  %s2041_s1 = inlined_call_operand.vmem [shape: f32[2,8,32], index: 1, kind: input, shape index: {}]   ;;  %s2042_s2 = inlined_call_operand.vmem [shape: f32[4,32,8], index: 2, kind: input, shape index: {}]   ;;  %s2043_s3 = inlined_call_operand.vmem [shape: f32[4,32,8], index: 3, kind: input, shape index: {}]   ;;  %s2044_s4 = inlined_call_operand.hbm [shape: f32[2,4,8,8], index: 4, kind: output, shape index: {}]  }
   0x1   :  { %11 = vsyncpa [#allocation5 + $0x1], 0  ;;  %s1747_s15 = smov 0   ;;  %s1749_s16 = smov 0  }
   0x2   :  { %s1751_s17 = smov 0   ;;  %s1753_s18 = smov 0  }
   0x3   :  { %s1755_s19 = smov 0   ;;  %s1757_s20 = smov 0  }
   0x4 LB: > { %s1315_s21 = sadd.s32 4294967295, %s1714_s20   ;;  %s1316_s22 = sadd.s32 4294967294, %s1714_s20   ;;  %s1714_s20 = sphi %s1757_s20, %s17_s20   ;;  %s1710_s19 = sphi %s1755_s19, %s2051_s19   ;;  %s1706_s18 = sphi %s1753_s18, %s2050_s18   ;;  %s1702_s17 = sphi %s1751_s17, %s2049_s17   ;;  %s1698_s16 = sphi %s1749_s16, %s2048_s16   ;;  %s1694_s15 = sphi %s1747_s15, %s2047_s15  }
   0x5   : > { %s36_s23 = sadd.s32 1, %s1710_s19  ;;  %s145_s24 = sadd.s32 1, %s1702_s17 }
   0x6   : > { %p38_p0 = scmp.ge.s32.totalorder %s36_s23, 2  ;;  %p155_p1 = scmp.ne.s32.totalorder %s1702_s17, %s1698_s16 }
   0x7   : > { %p156_p2 = scmp.eq.s32.totalorder %s1315_s21, 1  ;;  %p161_p3 = scmp.ne.s32.totalorder %s1698_s16, %s1694_s15 }
   0x8   : > { %s2053_s23 = smov (%p38_p0, %s36_s23), 0  ;;  %p162_p5 = scmp.eq.s32.totalorder %s1316_s22, 1 }
   0x9   : > { %p1787_p4 = por %p156_p2, %p155_p1  ;;  %s138_s26 = ssub.s32 %s1710_s19, %s2053_s23 }
   0xa   : > { %p1319_p6 = scmp.ge.s32.totalorder %s1714_s20, 1  ;;  %p143_p7 = scmp.eq.s32.totalorder %s138_s26, 0 }
   0xb   : > { %p1794_p8 = por %p162_p5, %p161_p3  ;;  %p206_p9 = scmp.lt.s32.totalorder %s1714_s20, 3 }
   0xc   : > { %s1800_s28 = scalar_select %p143_p7, %s1702_s17, %s145_s24  }
   0xd   : > { %p207_p10 = pnand %p1319_p6, %p206_p9 }
   0xe   : > { %v260_v0 = vld [vmem:[%s2042_s2] sm:$0xff] (!%p207_p10)  ;;  %v261_v1 = vld [vmem:[%s2042_s2 + $0x8] sm:$0xff] (!%p207_p10)  ;;  %v1716_v3 = vmov (!%p207_p10), 0.0|0.0   ;;  %v262_v6 = vld [vmem:[%s2042_s2 + $0x10] sm:$0xff] (!%p207_p10)  ;;  %p241_p11 = scmp.lt.s32.totalorder (!%p207_p10), %s1706_s18, 1  ;;  %vm1717_vm0 = vmmov (!%p207_p10), 0  }
   0xf   : > { %210 = sbr.rel (%p207_p10) target bundleno = 501 (0x1f5), region = 36  ;;  %v1324_v2 = vld [vmem:[%s2042_s2 + $0x20] sm:$0xff] (!%p207_p10)  ;;  %1528 = vmatprep.subr.bf16.mxu0 (!%p207_p10), %v1716_v3  ;;  %1534 = vmatprep.subr.bf16.mxu1 (!%p207_p10), %v1716_v3  ;;  %v1529_v4 = vpack.c.bf16 (!%p207_p10), %v261_v1, %v260_v0  ;;  %v1325_v5 = vld [vmem:[%s2042_s2 + $0x28] sm:$0xff] (!%p207_p10)  ;;  %v263_v7 = vld [vmem:[%s2042_s2 + $0x18] sm:$0xff] (!%p207_p10)  ;;  %v1718_v11 = vmov (!%p207_p10), 0.0   ;;  %vm264_vm1 = vcmask (!%p207_p10), 261120  }
  0x10   : > { %v1535_v8 = vpack.c.bf16 (!%p207_p10), %v1325_v5, %v1324_v2  ;;  %v1326_v9 = vld [vmem:[%s2042_s2 + $0x30] sm:$0xff] (!%p207_p10)  ;;  %v1327_v10 = vld [vmem:[%s2042_s2 + $0x38] sm:$0xff] (!%p207_p10)  ;;  %1428 = vmatprep.mubr.msk.f32.mxu0 (!%p207_p10), %vm1717_vm0, %v1718_v11  ;;  %1439 = vmatprep.mubr.msk.f32.mxu1 (!%p207_p10), %vm1717_vm0, %v1718_v11  ;;  %v1532_v12 = vpack.c.bf16 (!%p207_p10), %v263_v7, %v262_v6  ;;  %v1329_v14 = vld [vmem:[%s2042_s2 + $0x40] sm:$0xff] (!%p207_p10)  ;;  %vm338_vm2 = vcmask (!%p207_p10), 64512   ;;  %s1719_s7 = smov (!%p207_p10), [#allocation4]  }
  0x11   : > { %1530 = vmatpush3.bf16.msra.mxu0 (!%p207_p10), %v1529_v4  ;;  %v1538_v13 = vpack.c.bf16 (!%p207_p10), %v1327_v10, %v1326_v9  ;;  %v1330_v15 = vld [vmem:[%s2042_s2 + $0x48] sm:$0xff] (!%p207_p10)  ;;  %v1334_v16 = vld [vmem:[%s2042_s2 + $0x60] sm:$0xff] (!%p207_p10)  ;;  %v1331_v21 = vld [vmem:[%s2042_s2 + $0x50] sm:$0xff] (!%p207_p10)  ;;  %s1640_s9 = sshll.u32 (!%p207_p10), %s1719_s7, 4  ;;  %s1641_s9 = int_to_ptr.vmem [resolvable:$false] %s1640_s9 }
  0x12   : > { %1536 = vmatpush3.bf16.msra.mxu1 (!%p207_p10), %v1535_v8  ;;  %1531 = vmatprep.subr.bf16.mxu0 (!%p207_p10), %v1716_v3  ;;  %v1335_v17 = vld [vmem:[%s2042_s2 + $0x68] sm:$0xff] (!%p207_p10)  ;;  %v1541_v19 = vpack.c.bf16 (!%p207_p10), %v1330_v15, %v1329_v14  ;;  %v1332_v22 = vld [vmem:[%s2042_s2 + $0x58] sm:$0xff] (!%p207_p10)  ;;  %v1336_v23 = vld [vmem:[%s2042_s2 + $0x70] sm:$0xff] (!%p207_p10)  ;;  %s1642_s10 = scalar_lea.vmem (!%p207_p10), %s1641_s9, 1024 }
  0x13   : > { %1537 = vmatprep.subr.bf16.mxu1 (!%p207_p10), %v1716_v3  ;;  %v1547_v20 = vpack.c.bf16 (!%p207_p10), %v1335_v17, %v1334_v16  ;;  %v1337_v24 = vld [vmem:[%s2042_s2 + $0x78] sm:$0xff] (!%p207_p10)  ;;  %v1544_v25 = vpack.c.bf16 (!%p207_p10), %v1332_v22, %v1331_v21  ;;  %v572_v27 = vld [vmem:[%s2043_s3] sm:$0xff] (!%p207_p10)  ;;  %v573_v28 = vld [vmem:[%s2043_s3 + $0x8] sm:$0xff] (!%p207_p10) }
  0x14   : > { %v1550_v26 = vpack.c.bf16 (!%p207_p10), %v1337_v24, %v1336_v23  ;;  %v1340_v29 = vld [vmem:[%s2043_s3 + $0x20] sm:$0xff] (!%p207_p10)  ;;  %v1341_v30 = vld [vmem:[%s2043_s3 + $0x28] sm:$0xff] (!%p207_p10)  ;;  %v1553_v31 = vpack.c.bf16 (!%p207_p10), %v573_v28, %v572_v27  ;;  %v574_v33 = vld [vmem:[%s2043_s3 + $0x10] sm:$0xff] (!%p207_p10) }
  0x15   : > { %1533 = vmatpush3.bf16.msra.mxu0 (!%p207_p10), %v1532_v12  ;;  %v1559_v32 = vpack.c.bf16 (!%p207_p10), %v1341_v30, %v1340_v29  ;;  %v575_v34 = vld [vmem:[%s2043_s3 + $0x18] sm:$0xff] (!%p207_p10)  ;;  %v1342_v35 = vld [vmem:[%s2043_s3 + $0x30] sm:$0xff] (!%p207_p10)  ;;  %v1345_v39 = vld [vmem:[%s2043_s3 + $0x40] sm:$0xff] (!%p207_p10) }
  0x16   : > { %s1834_s29 = scalar_select %p241_p11, %s1706_s18, 1  ;;  %1539 = vmatpush3.bf16.msra.mxu1 %v1538_v13  ;;  %1540 = vmatprep.subr.bf16.mxu0 %v1716_v3  ;;  %v1343_v36 = vld [vmem:[%s2043_s3 + $0x38] sm:$0xff]  ;;  %v1556_v37 = vpack.c.bf16 %v575_v34, %v574_v33  ;;  %v1346_v40 = vld [vmem:[%s2043_s3 + $0x48] sm:$0xff]  ;;  %v1350_v41 = vld [vmem:[%s2043_s3 + $0x60] sm:$0xff] }
  0x17   : > { %1546 = vmatprep.subr.bf16.mxu1 %v1716_v3  ;;  %v1562_v38 = vpack.c.bf16 %v1343_v36, %v1342_v35  ;;  %v1351_v42 = vld [vmem:[%s2043_s3 + $0x68] sm:$0xff]  ;;  %v1565_v44 = vpack.c.bf16 %v1346_v40, %v1345_v39  ;;  %v1347_v46 = vld [vmem:[%s2043_s3 + $0x50] sm:$0xff]  ;;  %v1348_v47 = vld [vmem:[%s2043_s3 + $0x58] sm:$0xff] }
  0x18   : > { %s1321_s8 = sshll.u32 %s1834_s29, 3  ;;  %v1571_v45 = vpack.c.bf16 %v1351_v42, %v1350_v41  ;;  %v1352_v48 = vld [vmem:[%s2043_s3 + $0x70] sm:$0xff]  ;;  %v1353_v49 = vld [vmem:[%s2043_s3 + $0x78] sm:$0xff]  ;;  %v1568_v50 = vpack.c.bf16 %v1348_v47, %v1347_v46  ;;  %s1371_s29 = sshll.u32 %s1706_s18, 9 }
  0x19   : > { %s247_s21 = scalar_lea.vmem %s2040_s0, %s1321_s8  ;;  %s254_s14 = scalar_lea.vmem %s2041_s1, %s1321_s8  ;;  %v1574_v51 = vpack.c.bf16 %v1353_v49, %v1352_v48 }
  0x1a   : > { %v259_v18 = vld [vmem:[%s247_s21] sm:$0xff]  ;;  %s238_s21 = sand.u32 1, %s1698_s16   ;;  %s1990_s5 = scalar_lea.hbm %s2044_s4, %s1371_s29 }
  0x1b   : > { %1429 = vmatmul.mubr.msk.f32.vlgmr.msra.gmra.mrb[0].mxu0 %vm264_vm1, %v259_v18  ;;  %1440 = vmatmul.mubr.msk.f32.vlgmr.msra.gmra.mrb[0].mxu1 %vm264_vm1, %v259_v18  ;;  %v571_v43 = vld [vmem:[%s254_s14] sm:$0xff]  ;;  %s1320_s22 = sshll.u32 %s238_s21, 5  ;;  %s1994_s6 = scalar_lea.sflag [#allocation5], %s238_s21 }
  0x1c   : > { %1542 = vmatpush3.bf16.msra.mxu0 %v1541_v19  ;;  %1548 = vmatpush3.bf16.msra.mxu1 %v1547_v20  ;;  %s240_s24 = scalar_lea.vmem [#allocation4], %s1320_s22 }
  0x1d   : > { %1543 = vmatprep.subr.bf16.mxu0 %v1716_v3  ;;  %1549 = vmatprep.subr.bf16.mxu1 %v1716_v3  ;;  %s1221_s26 = sshll.u32 %s240_s24, 4  ;;  %s1985_s26 = int_to_ptr.vmem [resolvable:$true] %s1221_s26 }
  0x1e   : > { %1450 = vmatprep.mubr.msk.f32.mxu0 %vm1717_vm0, %v1718_v11  ;;  %1461 = vmatprep.mubr.msk.f32.mxu1 %vm1717_vm0, %v1718_v11  ;;  %s1636_s18 = scalar_lea.vmem %s1985_s26, 512  ;;  %p1643_p1 = scmp.lt.s32.totalorder %s1985_s26, %s1641_s9 }
  0x1f   : > { %p1637_p12 = scmp.ne.s32.totalorder %s1985_s26, %s1636_s18  ;;  %p1644_p2 = scmp.lt.s32.totalorder %s1642_s10, %s1636_s18 }
  0x20   : > { %1545 = vmatpush3.bf16.msra.mxu0 %v1544_v25  ;;  %1551 = vmatpush3.bf16.msra.mxu1 %v1550_v26 }
  0x21   : > { %1552 = vmatprep.subr.bf16.mxu0 %v1716_v3  ;;  %1558 = vmatprep.subr.bf16.mxu1 %v1716_v3  ;;  %p1638_p13 = pnand %p1637_p12, %p1787_p4  ;;  %p1645_p3 = por %p1644_p2, %p1643_p1 }
  0x23   : > { %1451 = vmatmul.mubr.msk.f32.vlgmr.msra.gmra.mrb[2].mxu0 %vm264_vm1, %v259_v18  ;;  %1462 = vmatmul.mubr.msk.f32.vlgmr.msra.gmra.mrb[2].mxu1 %vm264_vm1, %v259_v18  ;;  %p1639_p0 = pneg %p1638_p13 }
  0x24   : > { %1554 = vmatpush3.bf16.msra.mxu0 %v1553_v31  ;;  %1560 = vmatpush3.bf16.msra.mxu1 %v1559_v32 }
  0x25   : > { %1555 = vmatprep.subr.bf16.mxu0 %v1716_v3  ;;  %1561 = vmatprep.subr.bf16.mxu1 %v1716_v3  ;;  %p1646_p5 = pnand %p1645_p3, %p1639_p0 }
  0x26   : > { %1472 = vmatprep.mubr.msk.f32.mxu0 %vm1717_vm0, %v1718_v11  ;;  %1483 = vmatprep.mubr.msk.f32.mxu1 %vm1717_vm0, %v1718_v11 }
  0x28   : > { %1557 = vmatpush3.bf16.msra.mxu0 %v1556_v37  ;;  %1563 = vmatpush3.bf16.msra.mxu1 %v1562_v38 }
  0x29   : > { %1564 = vmatprep.subr.bf16.mxu0 %v1716_v3  ;;  %1570 = vmatprep.subr.bf16.mxu1 %v1716_v3 }
  0x2b   : > { %1473 = vmatmul.mubr.msk.f32.vlgmr.msra.gmra.mrb[4].mxu0 %vm264_vm1, %v571_v43  ;;  %1484 = vmatmul.mubr.msk.f32.vlgmr.msra.gmra.mrb[4].mxu1 %vm264_vm1, %v571_v43 }
  0x2c   : > { %1566 = vmatpush3.bf16.msra.mxu0 %v1565_v44  ;;  %1572 = vmatpush3.bf16.msra.mxu1 %v1571_v45 }
  0x2d   : > { %1567 = vmatprep.subr.bf16.mxu0 %v1716_v3  ;;  %1573 = vmatprep.subr.bf16.mxu1 %v1716_v3 }
  0x2e   : > { %1494 = vmatprep.mubr.msk.f32.mxu0 %vm1717_vm0, %v1718_v11  ;;  %1505 = vmatprep.mubr.msk.f32.mxu1 %vm1717_vm0, %v1718_v11 }
  0x30   : > { %1569 = vmatpush3.bf16.msra.mxu0 %v1568_v50  ;;  %1575 = vmatpush3.bf16.msra.mxu1 %v1574_v51 }
  0x31   : > { %1508 = vmatprep.subr.mxu0 %v1718_v11  ;;  %1513 = vmatprep.subr.mxu1 %v1718_v11 }
  0x33   : > { %1495 = vmatmul.mubr.msk.f32.vlgmr.msra.gmra.mrb[6].mxu0 %vm264_vm1, %v571_v43  ;;  %1506 = vmatmul.mubr.msk.f32.vlgmr.msra.gmra.mrb[6].mxu1 %vm264_vm1, %v571_v43 }
  0x34   : > { %1510 = vmatprep.mubr.msk.f32.mxu0 %vm1717_vm0, %v1718_v11  ;;  %1515 = vmatprep.mubr.msk.f32.mxu1 %vm1717_vm0, %v1718_v11 }
  0xee   : > { %v334_v52 = vpop.f32.mrb[0].mxu0  ;;  %v411_v53 = vpop.f32.mrb[0].mxu1 }
  0xef   : > { %339 = vst.msk [vmem:[#allocation2] sm:$0xff] %vm338_vm2, %v334_v52  ;;  %v1430_v54 = vpop.f32.mrb[1].mxu0  ;;  %416 = vst.msk [vmem:[#allocation2 + $0x8] sm:$0xff] %vm338_vm2, %v411_v53  ;;  %v1441_v55 = vpop.f32.mrb[1].mxu1 }
  0xf6   : > { %v488_v56 = vpop.f32.mrb[2].mxu0  ;;  %v565_v57 = vpop.f32.mrb[2].mxu1  ;;  %v883_v6 = vld [vmem:[#allocation2] sm:$0xff]  ;;  %v963_v7 = vld [vmem:[#allocation2 + $0x8] sm:$0xff] }
  0xf7   : > { %493 = vst.msk [vmem:[#allocation2 + $0x10] sm:$0xff] %vm338_vm2, %v488_v56  ;;  %v1452_v58 = vpop.f32.mrb[3].mxu0  ;;  %570 = vst.msk [vmem:[#allocation2 + $0x18] sm:$0xff] %vm338_vm2, %v565_v57  ;;  %v1463_v59 = vpop.f32.mrb[3].mxu1 }
  0xfe   : > { %v646_v60 = vpop.f32.mrb[4].mxu0  ;;  %v723_v61 = vpop.f32.mrb[4].mxu1  ;;  %v1044_v10 = vld [vmem:[#allocation2 + $0x10] sm:$0xff]  ;;  %v1125_v12 = vld [vmem:[#allocation2 + $0x18] sm:$0xff] }
  0xff   : > { %651 = vst.msk [vmem:[#allocation3] sm:$0xff] %vm338_vm2, %v646_v60  ;;  %v1474_v62 = vpop.f32.mrb[5].mxu0  ;;  %728 = vst.msk [vmem:[#allocation3 + $0x8] sm:$0xff] %vm338_vm2, %v723_v61  ;;  %v1485_v63 = vpop.f32.mrb[5].mxu1 }
 0x106   : > { %v800_v0 = vpop.f32.mrb[6].mxu0  ;;  %v884_v1 = vld [vmem:[#allocation3] sm:$0xff]  ;;  %v877_v2 = vpop.f32.mrb[6].mxu1  ;;  %v964_v4 = vld [vmem:[#allocation3 + $0x8] sm:$0xff] }
 0x107   : > { %805 = vst.msk [vmem:[#allocation3 + $0x10] sm:$0xff] %vm338_vm2, %v800_v0  ;;  %v1496_v3 = vpop.f32.mrb[7].mxu0  ;;  %1509 = vmatpush3.xpose.msk.msra.mxu0 %vm338_vm2, %v884_v1  ;;  %882 = vst.msk [vmem:[#allocation3 + $0x18] sm:$0xff] %vm338_vm2, %v877_v2  ;;  %v1507_v5 = vpop.f32.mrb[7].mxu1  ;;  %1514 = vmatpush3.xpose.msk.msra.mxu1 %vm338_vm2, %v964_v4 }
 0x108   : > { %1518 = vmatprep.subr.mxu0 %v1718_v11  ;;  %1523 = vmatprep.subr.mxu1 %v1718_v11 }
 0x10a   : > { %1511 = vmatmul.mubr.msk.f32.vlgmr.msra.gmra.mrb[8].mxu0 %vm338_vm2, %v883_v6  ;;  %1516 = vmatmul.mubr.msk.f32.vlgmr.msra.gmra.mrb[8].mxu1 %vm338_vm2, %v963_v7 }
 0x10b   : > { %1520 = vmatprep.mubr.msk.f32.mxu0 %vm1717_vm0, %v1718_v11  ;;  %1525 = vmatprep.mubr.msk.f32.mxu1 %vm1717_vm0, %v1718_v11 }
 0x10e   : > { %v1045_v8 = vld [vmem:[#allocation3 + $0x10] sm:$0xff]  ;;  %v1126_v9 = vld [vmem:[#allocation3 + $0x18] sm:$0xff] }
 0x10f   : > { %1519 = vmatpush3.xpose.msk.msra.mxu0 %vm338_vm2, %v1045_v8  ;;  %1524 = vmatpush3.xpose.msk.msra.mxu1 %vm338_vm2, %v1126_v9 }
 0x112   : > { %1521 = vmatmul.mubr.msk.f32.vlgmr.msra.gmra.mrb[10].mxu0 %vm338_vm2, %v1044_v10  ;;  %1526 = vmatmul.mubr.msk.f32.vlgmr.msra.gmra.mrb[10].mxu1 %vm338_vm2, %v1125_v12 }
 0x1dd   : > { %v957_v13 = vpop.f32.mrb[8].mxu0  ;;  %v1037_v11 = vpop.f32.mrb[8].mxu1 }
 0x1de   : > { %961 = vst.msk [vmem:[%s240_s24] sm:$0xff] %vm338_vm2, %v957_v13  ;;  %v1512_v14 = vpop.f32.mrb[9].mxu0  ;;  %1359 = vst.msk [vmem:[%s240_s24 + $0x8] sm:$0xff] %vm338_vm2, %v1037_v11  ;;  %v1517_v15 = vpop.f32.mrb[9].mxu1 }
 0x1e5   : > { %v1118_v16 = vpop.f32.mrb[10].mxu0  ;;  %v1199_v17 = vpop.f32.mrb[10].mxu1 }
 0x1e6   : > { %1362 = vst.msk [vmem:[%s240_s24 + $0x10] sm:$0xff] %vm338_vm2, %v1118_v16  ;;  %v1522_v18 = vpop.f32.mrb[11].mxu0  ;;  %1365 = vst.msk [vmem:[%s240_s24 + $0x18] sm:$0xff] %vm338_vm2, %v1199_v17  ;;  %v1527_v19 = vpop.f32.mrb[11].mxu1 }
 0x1e7   : > { %1649 = shalt.err (!%p1646_p5)
}
 0x1e8   : > { %s1650_s11 = scalar_lea.hbm %s1990_s5, 512  ;;  %s1654_s14 = scalar_lea.hbm %s2044_s4, 1024 }
 0x1e9   : > { %p1651_p6 = scmp.ne.s32.totalorder %s1990_s5, %s1650_s11  ;;  %p1655_p10 = scmp.lt.u32.totalorder %s1990_s5, %s2044_s4 }
 0x1ea   : > { %p1656_p11 = scmp.lt.u32.totalorder %s1654_s14, %s1650_s11  ;;  %p1658_p13 = scmp.lt.u32.totalorder %s1650_s11, %s1990_s5 }
 0x1eb   : > { %p1652_p7 = pnand %p1651_p6, %p1787_p4 }
 0x1ec   : > { %p1657_p12 = por %p1656_p11, %p1655_p10 }
 0x1ed   : > { %p1653_p9 = pneg %p1652_p7 }
 0x1ee   : > { %p1659_p0 = por %p1658_p13, %p1657_p12 }
 0x1f0   : > { %p1660_p1 = pnand %p1659_p0, %p1653_p9 }
 0x1f2   : > { %1663 = shalt.err (!%p1660_p1)
}
 0x1f3   : > { %s1720_s24 = smov 128   ;;  %s1721_s29 = smov 8  }
 0x1f4   : > { %1576 = dma.vmem_to_hbm [thread:$0]  (%p1787_p4), %s1985_s26, 512, %s1990_s5, %s1994_s6, %s1720_s24, %s1720_s24, %s1721_s29  }
 0x1f5 PF: > { %p1582_p2 = scmp.ge.s32.totalorder %s1714_s20, 2  ;;  %s1236_s30 = sand.u32 1, %s1694_s15  }
 0x1f6   : > { %s1237_s8 = scalar_lea.sflag [#allocation5], %s1236_s30 }
 0x1f7   : > { %p1579_p3 = pnand %p1582_p2, %p1794_p8 }
 0x1f9   : > { %1689 = dma.done.wait (!%p1579_p3), %s1237_s8, 512  }
 0x1fa   : > { %1691 = vsyncadd (!%p1579_p3), %s1237_s8, 4294966784  ;;  %s17_s20 = sadd.s32 1, %s1714_s20   ;;  %s2047_s15 = smov %s1698_s16 }
 0x1fb   : > { %p14_p5 = scmp.ge.s32.totalorder %s17_s20, 4   ;;  %s2048_s16 = smov %s1702_s17 }
 0x1fc   : > { %s2049_s17 = smov %s1800_s28  ;;  %s2050_s18 = smov %s1710_s19 }
 0x1fd   : > { %s2051_s19 = smov %s2053_s23  ;;  %16 = sbr.rel (!%p14_p5) target bundleno = 4 (0x4), region = 96 }
 0x204   :  { %1242 = vsyncpa [#allocation5], 1 }
 0x205   :  { %1244 = vsyncpa [#allocation5 + $0x1], 1 }

</bundles_post_ra>
